<compile_context>
chip_gen: v5e
topology: v5e:2x2
jax: 0.10.0
libtpu: 0.0.40
codegen_flags: <defaults>
</compile_context>

<pallas_src>
import functools

import jax
import jax.numpy as jnp
from jax.experimental import pallas as pl
from jax.experimental.pallas import tpu as pltpu


def _sine_kernel(w0_ref, x_ref, o_ref):
    # Elementwise: one VPU multiply + sin (VPU range-reduction + polynomial).
    w0 = w0_ref[0]
    x = x_ref[...]
    if x.dtype != jnp.float32:
        # TODO(synk): on v6e/v7x (bf16-capable VPU) a bf16 polynomial path
        # would ~double VALU throughput if SIREN accuracy allows; keep f32
        # for accuracy and for v5e (no bf16 VPU/EUP).
        x = x.astype(jnp.float32)
    o_ref[...] = jnp.sin(w0 * x).astype(o_ref.dtype)


# Widest first: longer unmasked rows improve vld/vst slot efficiency; tile
# bytes are bounded by the row-tile budget so there is no VMEM downside.
_LANE_CANDIDATES = (8192, 4096, 2048, 1024, 512, 256, 128)


@functools.lru_cache(maxsize=1)
def _tile_budget():
    """(target_tile_bytes, vmem_limit_bytes) chosen per TPU generation."""
    vmem_bytes = 64 << 20  # conservative default = v7x physical VMEM
    try:
        info = pltpu.get_tpu_info()
        vmem_bytes = int(getattr(info, "vmem_capacity_bytes", vmem_bytes))
    except Exception:
        pass
    if vmem_bytes >= (96 << 20):   # v5e / v6e: 128 MiB physical VMEM
        return 8 << 20, 64 << 20   # 8 MiB tiles -> 32 MiB double-buffered
    return 4 << 20, 48 << 20       # v7x: 64 MiB physical -> 16 MiB footprint


def _run_pallas(x2, w0_arr, out_dtype):
    """Run sin(w0*x) on a lane-dense 2-D slab (rows, lane_width)."""
    rows, lane_width = x2.shape
    itemsize = jnp.dtype(out_dtype).itemsize
    # Packed-sublane group: 8 for f32, 16 for bf16/f16, 32 for int8/fp8.
    sublane_group = max(8, 32 // itemsize)

    target_tile_bytes, vmem_limit = _tile_budget()
    target_rows = max(sublane_group, target_tile_bytes // (lane_width * itemsize))
    target_rows -= target_rows % sublane_group

    if rows > target_rows:
        tile_rows = target_rows          # grid >= 2 automatically
    elif rows >= 2 * sublane_group:
        # Small tensor: still emit >= 2 grid steps so the "parallel" axis can
        # shard across both TensorCores on v7x (grid=(1,) pins one TC).
        half = -(-rows // 2)
        tile_rows = min(-(-half // sublane_group) * sublane_group, rows)
    else:
        tile_rows = rows                 # single block covering full extent
    grid = (pl.cdiv(rows, tile_rows),)   # ragged last block handled by Pallas

    return pl.pallas_call(
        _sine_kernel,
        out_shape=jax.ShapeDtypeStruct((rows, lane_width), out_dtype),
        grid_spec=pltpu.PrefetchScalarGridSpec(
            num_scalar_prefetch=0,
            grid=grid,
            in_specs=[
                pl.BlockSpec(memory_space=pltpu.MemorySpace.SMEM),  # w0 (1,)
                pl.BlockSpec((tile_rows, lane_width), lambda i: (i, 0)),
            ],
            out_specs=pl.BlockSpec((tile_rows, lane_width), lambda i: (i, 0)),
        ),
        compiler_params=pltpu.CompilerParams(
            dimension_semantics=("parallel",),   # megacore-shard on v7x
            vmem_limit_bytes=vmem_limit,
        ),
    )(w0_arr, x2)


def sine(x, w0=1.0):
    """y = sin(w0 * x), same shape/dtype as x. Matches torch.sin(w0 * x)."""
    orig_shape = x.shape
    dtype = x.dtype
    n = x.size
    if n == 0:
        return x

    w0_arr = jnp.asarray(w0, dtype=jnp.float32).reshape((1,))
    flat = x.reshape(-1)  # contiguous re-view, no data movement

    # Fast path: a wide multiple of 128 divides n exactly -> zero extra copies.
    lane_width = next((c for c in _LANE_CANDIDATES if n % c == 0), None)
    if lane_width is not None:
        out = _run_pallas(flat.reshape(n // lane_width, lane_width), w0_arr, dtype)
        return out.reshape(orig_shape)

    # Fallback (n % 128 != 0): run the kernel on the aligned prefix and handle
    # the tiny (<128-element) tail with plain jnp.sin.  This avoids the
    # full-tensor pad pass of the previous version.
    n_main = n - (n % 128)
    tail = flat[n_main:]
    tail_out = jnp.sin(w0_arr[0] * tail.astype(jnp.float32)).astype(dtype)
    if n_main == 0:
        return tail_out.reshape(orig_shape)
    lane_width = next(c for c in _LANE_CANDIDATES if n_main % c == 0)  # >= 128
    main = flat[:n_main].reshape(n_main // lane_width, lane_width)
    main_out = _run_pallas(main, w0_arr, dtype)
    return jnp.concatenate([main_out.reshape(-1), tail_out]).reshape(orig_shape)


if __name__ == "__main__":
    w0 = 30.0  # typical SIREN w0; module default is 1.0, any scalar works

    # NCHW-like input consistent with how Sine is used inside SIREN/DDiF.
    x = jax.random.normal(jax.random.PRNGKey(0), (2, 4, 16, 16), dtype=jnp.float32)
    y = jax.block_until_ready(sine(x, w0=w0))
    assert y.shape == x.shape and y.dtype == x.dtype
    assert jnp.allclose(y, jnp.sin(w0 * x), atol=1e-5, rtol=1e-5)

    # Aligned path with >= 2 row blocks and a ragged (masked) last block.
    x1 = jax.random.normal(jax.random.PRNGKey(1), (17, 128), dtype=jnp.float32)
    y1 = jax.block_until_ready(sine(x1, w0=w0))
    assert y1.shape == x1.shape and y1.dtype == x1.dtype
    assert jnp.allclose(y1, jnp.sin(w0 * x1), atol=1e-5, rtol=1e-5)

    # Element count not a multiple of 128: aligned-prefix kernel + tiny tail.
    x2 = jax.random.normal(jax.random.PRNGKey(2), (5, 300), dtype=jnp.float32)
    y2 = jax.block_until_ready(sine(x2, w0=w0))
    assert y2.shape == x2.shape and y2.dtype == x2.dtype
    assert jnp.allclose(y2, jnp.sin(w0 * x2), atol=1e-5, rtol=1e-5)

    # Sub-128-element tensor: pure-tail fallback.
    x3 = jax.random.normal(jax.random.PRNGKey(3), (3, 5, 7), dtype=jnp.float32)
    y3 = jax.block_until_ready(sine(x3, w0=w0))
    assert y3.shape == x3.shape and y3.dtype == x3.dtype
    assert jnp.allclose(y3, jnp.sin(w0 * x3), atol=1e-5, rtol=1e-5)

    print("KERNEL_OK")
</pallas_src>

<mosaic_0001>
module attributes {stable_mosaic.version = 11 : i64} {
  func.func @_sine_kernel(%arg0: i32, %arg1: memref<1xf32, #tpu.memory_space<smem>>, %arg2: memref<1x2048xf32, #tpu.memory_space<vmem>>, %arg3: memref<1x2048xf32, #tpu.memory_space<vmem>>) attributes {dimension_semantics = [#tpu.dimension_semantics<parallel>], iteration_bounds = array<i64: 1>, scalar_prefetch = 0 : i64, scratch_operands = 0 : i64, tpu.core_type = #tpu.core_type<tc>, window_params = [{transform_indices = @transform_0, window_bounds = array<i64: 1>}, {transform_indices = @transform_1, window_bounds = array<i64: 1, 2048>}, {transform_indices = @transform_2, window_bounds = array<i64: 1, 2048>}]} {
    %c0 = arith.constant 0 : index
    %0 = memref.load %arg1[%c0] : memref<1xf32, #tpu.memory_space<smem>>
    %c0_0 = arith.constant 0 : index
    %c0_1 = arith.constant 0 : index
    %1 = vector.load %arg2[%c0_0, %c0_1] : memref<1x2048xf32, #tpu.memory_space<vmem>>, vector<1x2048xf32>
    %2 = vector.broadcast %0 : f32 to vector<1x2048xf32>
    %3 = arith.mulf %2, %1 : vector<1x2048xf32>
    %4 = math.sin %3 : vector<1x2048xf32>
    %c0_2 = arith.constant 0 : index
    %c0_3 = arith.constant 0 : index
    %5 = vector.load %arg3[%c0_2, %c0_3] : memref<1x2048xf32, #tpu.memory_space<vmem>>, vector<1x2048xf32>
    tpu.vector_store %arg3[%c0_2, %c0_3], %4 {strides = array<i32>} : memref<1x2048xf32, #tpu.memory_space<vmem>>, vector<1x2048xf32>,
    return
  }
  func.func @transform_0(%arg0: i32) -> i32 {
    %c0_i32 = arith.constant 0 : i32
    %c0_i32_0 = arith.constant 0 : i32
    return %c0_i32 : i32
  }
  func.func @transform_1(%arg0: i32) -> (i32, i32) {
    %c0_i32 = arith.constant 0 : i32
    %c0_i32_0 = arith.constant 0 : i32
    return %arg0, %c0_i32 : i32, i32
  }
  func.func @transform_2(%arg0: i32) -> (i32, i32) {
    %c0_i32 = arith.constant 0 : i32
    %c0_i32_0 = arith.constant 0 : i32
    return %arg0, %c0_i32 : i32, i32
  }
}

</mosaic_0001>

<bundles_post_ra>
// kernel: tpu_custom_call.1
= control target key start
LH: loop header
LB: loop body
LE: loop exit
PB: predicated region body
PF: predicated region fallthrough
CT: control target
= control target key end

     0   :  { %8 = vsyncpa [#allocation4], 0  ;;  %s635_s0 = inlined_call_operand.<no memory space> [shape: f32[1], index: 0, kind: input, shape index: {}]   ;;  %s636_s1 = inlined_call_operand.hbm [shape: f32[1,2048], index: 1, kind: input, shape index: {}]   ;;  %s637_s2 = inlined_call_operand.hbm [shape: f32[1,2048], index: 2, kind: output, shape index: {}]  }
   0x1   :  { %9 = vsyncpa [#allocation5], 0  ;;  %s17_s11 = sshll.u32 %s636_s1, 4  ;;  %s429_s12 = smov [#allocation3]   ;;  %s18_s11 = int_to_ptr.hbm [resolvable:$true] %s17_s11 }
   0x2   :  { %s19_s13 = sshll.u32 %s429_s12, 4  ;;  %s20_s13 = int_to_ptr.vmem [resolvable:$true] %s19_s13 }
   0x3   :  { %22 = dma.hbm_to_vmem [thread:$0]  %s18_s11, 256, %s20_s13, [#allocation4]  }
   0x4   :  { %425 = dma.done.wait [#allocation4], 256  }
   0x5   :  { %426 = vsyncadd [#allocation4], 4294967040  ;;  %v30_v0 = vstv %s635_s0  ;;  %v28_v1 = vld [vmem:[#allocation3] sm:$0xff]  ;;  %v29_v2 = vld [vmem:[#allocation3 + $0x8] sm:$0xff]  ;;  %v430_v26 = vmov 683565275  }
   0x6   :  { %v459_v3 = vmul.f32 %v30_v0, %v28_v1  ;;  %v461_v4 = vmul.f32 %v30_v0, %v29_v2  ;;  %v431_v28 = vmov 2475754826   ;;  %v432_v30 = vmov 2131351028   ;;  %s437_s0 = smov [#allocation6]   ;;  %s352_s18 = sshll.u32 %s637_s2, 4  ;;  %s353_s18 = int_to_ptr.hbm [resolvable:$true] %s352_s18 }
   0x7   :  { %v433_v32 = vmov 2102212464   ;;  %v434_v34 = vmov 920167782   ;;  %v435_v43 = vmov 1326507024  }
   0x8   :  { %v33_v5 = vand.u32 2147483647, %v459_v3  ;;  %v36_v6 = vand.u32 2139095040, %v459_v3  ;;  %v188_v7 = vand.u32 2147483647, %v461_v4  ;;  %v191_v8 = vand.u32 2139095040, %v461_v4 }
   0x9   :  { %s350_s1 = sshll.u32 %s437_s0, 4  ;;  %s351_s1 = int_to_ptr.vmem [resolvable:$true] %s350_s1 }
   0xa   :  { %v37_v9 = vshrl.u32 %v36_v6, 23  ;;  %v40_v10 = vand.u32 8388607, %v33_v5  ;;  %v192_v11 = vshrl.u32 %v191_v8, 23  ;;  %v195_v15 = vand.u32 8388607, %v188_v7 }
   0xc   :  { %v362_v12 = vadd.s32 4294967169, %v37_v9  ;;  %v41_v13 = vor.u32 8388608, %v40_v10  ;;  %v365_v14 = vadd.s32 4294967169, %v192_v11  ;;  %v196_v20 = vor.u32 8388608, %v195_v15 }
   0xe   :  { %v43_v16 = vadd.s32 1, %v362_v12  ;;  %v198_v17 = vadd.s32 1, %v365_v14  ;;  %v471_v19 = vshll.u32 %v41_v13, 8  ;;  %v481_v37 = vshll.u32 %v196_v20, 8 }
  0x10   :  { %vm44_vm0 = vcmp.gt.s32.totalorder %v43_v16, 0  ;;  %vm199_vm1 = vcmp.gt.s32.totalorder %v198_v17, 0  ;;  %v82_v36 = vand.u32 65535, %v471_v19  ;;  %v83_v41 = vshrl.u32 %v471_v19, 16 }
  0x11   :  { %v45_v18 = vsel %vm44_vm0, %v43_v16, 0  ;;  %v200_v22 = vsel %vm199_vm1, %v198_v17, 0 }
  0x12   :  { %v47_v21 = vand.u32 31, %v45_v18  ;;  %v473_v23 = vshrl.u32 %v45_v18, 5  ;;  %v475_v24 = vand.u32 31, %v200_v22  ;;  %v499_v54 = vshrl.u32 %v200_v22, 5 }
  0x14   :  { %v48_v25 = vsub.s32 32, %v47_v21  ;;  %v50_v27 = vshll.u32 %v430_v26, %v47_v21  ;;  %v53_v29 = vshll.u32 %v431_v28, %v47_v21  ;;  %v56_v31 = vshll.u32 %v432_v30, %v47_v21 }
  0x15   :  { %v59_v33 = vshll.u32 %v433_v32, %v47_v21  ;;  %v62_v35 = vshll.u32 %v434_v34, %v47_v21  ;;  %vm65_vm2 = vcmp.lt.s32.totalorder %v473_v23, 1  ;;  %vm68_vm3 = vcmp.lt.s32.totalorder %v473_v23, 4 }
  0x16   :  { %v51_v38 = vshrl.u32 %v431_v28, %v48_v25  ;;  %v54_v39 = vshrl.u32 %v432_v30, %v48_v25  ;;  %v57_v40 = vshrl.u32 %v433_v32, %v48_v25  ;;  %v60_v42 = vshrl.u32 %v434_v34, %v48_v25 }
  0x17   :  { %v63_v44 = vshrl.u32 %v435_v43, %v48_v25  ;;  %v490_v48 = vsub.s32 32, %v475_v24  ;;  %v49_v49 = vshrl.u32 %v430_v26, %v48_v25  ;;  %vm67_vm4 = vcmp.lt.s32.totalorder %v473_v23, 3 }
  0x18   :  { %v52_v45 = vor.u32 %v51_v38, %v50_v27  ;;  %v55_v46 = vor.u32 %v54_v39, %v53_v29  ;;  %v58_v47 = vor.u32 %v57_v40, %v56_v31  ;;  %v61_v50 = vor.u32 %v60_v42, %v59_v33 }
  0x19   :  { %v64_v51 = vor.u32 %v63_v44, %v62_v35  ;;  %vm66_vm5 = vcmp.lt.s32.totalorder %v473_v23, 2  ;;  %v205_v57 = vshll.u32 %v430_v26, %v475_v24  ;;  %v208_v58 = vshll.u32 %v431_v28, %v475_v24 }
  0x1a   :  { %v73_v52 = vsel %vm65_vm2, %v52_v45, %v55_v46  ;;  %v77_v53 = vsel %vm65_vm2, %v55_v46, %v58_v47  ;;  %v74_v55 = vsel %vm68_vm3, %v61_v50, 920167782  ;;  %v70_v59 = vsel %vm68_vm3, %v58_v47, 2102212464 }
  0x1b   :  { %v78_v56 = vsel %vm68_vm3, %v64_v51, 1326507024  ;;  %v75_v60 = vsel %vm67_vm4, %v58_v47, %v74_v55  ;;  %v206_v62 = vshrl.u32 %v431_v28, %v490_v48  ;;  %v69_v63 = vsel %vm65_vm2, %v49_v49, %v52_v45 }
  0x1c   :  { %v79_v61 = vsel %vm67_vm4, %v61_v50, %v78_v56  ;;  %v76_v0 = vsel %vm66_vm5, %v73_v52, %v75_v60  ;;  %v209_v2 = vshrl.u32 %v432_v30, %v490_v48  ;;  %v71_v11 = vsel %vm67_vm4, %v55_v46, %v70_v59 }
  0x1d   :  { %v80_v1 = vsel %vm66_vm5, %v77_v53, %v79_v61  ;;  %v106_v9 = vand.u32 65535, %v76_v0  ;;  %v107_v10 = vshrl.u32 %v76_v0, 16  ;;  %v524_v12 = vor.u32 %v206_v62, %v205_v57 }
  0x1e   :  { %v84_v6 = vand.u32 65535, %v80_v1  ;;  %v85_v8 = vshrl.u32 %v80_v1, 16  ;;  %v526_v13 = vor.u32 %v209_v2, %v208_v58  ;;  %v211_v14 = vshll.u32 %v432_v30, %v475_v24 }
  0x1f   :  { %v212_v18 = vshrl.u32 %v433_v32, %v490_v48  ;;  %v108_v21 = vmul.u32 %v106_v9, %v82_v36  ;;  %v109_v22 = vmul.u32 %v107_v10, %v82_v36  ;;  %v110_v25 = vmul.u32 %v106_v9, %v83_v41 }
  0x20   :  { %v86_v15 = vmul.u32 %v84_v6, %v82_v36  ;;  %v87_v16 = vmul.u32 %v85_v8, %v82_v36  ;;  %v88_v17 = vmul.u32 %v84_v6, %v83_v41  ;;  %v89_v20 = vmul.u32 %v85_v8, %v83_v41 }
  0x21   :  { %v111_v31 = vmul.u32 %v107_v10, %v83_v41  ;;  %v112_v35 = vshll.u32 %v109_v22, 16  ;;  %v113_v38 = vshrl.u32 %v109_v22, 16  ;;  %v114_v39 = vshll.u32 %v110_v25, 16 }
  0x22   :  { %v90_v27 = vshll.u32 %v87_v16, 16  ;;  %v91_v28 = vshrl.u32 %v87_v16, 16  ;;  %v92_v29 = vshll.u32 %v88_v17, 16  ;;  %v93_v33 = vshrl.u32 %v88_v17, 16 }
  0x23   :  { %v115_v40 = vshrl.u32 %v110_v25, 16  ;;  %v214_v42 = vshll.u32 %v433_v32, %v475_v24  ;;  %v436_v44 = vmov 0   ;;  %vm116_vm7 = vc.u32 %v108_v21, %v112_v35 }
  0x24   :  { %vm94_vm6 = vc.u32 %v86_v15, %v90_v27  ;;  %v96_v30 = vadd.s32 %v90_v27, %v86_v15  ;;  %v118_v36 = vadd.s32 %v112_v35, %v108_v21  ;;  %v215_v46 = vshrl.u32 %v434_v34, %v490_v48 }
  0x25   :  { %v95_v45 = vsel %vm94_vm6, 1, %v436_v44  ;;  %v117_v41 = vsel %vm116_vm7, 1, %v436_v44  ;;  %v217_v49 = vshll.u32 %v434_v34, %v475_v24  ;;  %v213_v32 = vor.u32 %v212_v18, %v211_v14 }
  0x26   :  { %v97_v47 = vadd.s32 %v95_v45, %v89_v20  ;;  %vm98_vm8 = vc.u32 %v96_v30, %v92_v29  ;;  %v119_v51 = vadd.s32 %v117_v41, %v111_v31  ;;  %vm120_vm9 = vc.u32 %v118_v36, %v114_v39 }
  0x27   :  { %v99_v50 = vsel %vm98_vm8, 1, %v436_v44  ;;  %v121_v53 = vsel %vm120_vm9, 1, %v436_v44  ;;  %v216_v55 = vor.u32 %v215_v46, %v214_v42  ;;  %v218_v56 = vshrl.u32 %v435_v43, %v490_v48 }
  0x28   :  { %v101_v52 = vadd.s32 %v99_v50, %v97_v47  ;;  %v543_v57 = vadd.s32 %v118_v36, %v114_v39  ;;  %v123_v58 = vadd.s32 %v121_v53, %v119_v51  ;;  %vm220_vm10 = vcmp.lt.s32.totalorder %v499_v54, 1 }
  0x29   :  { %vm222_vm11 = vcmp.lt.s32.totalorder %v499_v54, 3  ;;  %v219_v34 = vor.u32 %v218_v56, %v217_v49  ;;  %vm221_vm12 = vcmp.lt.s32.totalorder %v499_v54, 2  ;;  %vm223_vm13 = vcmp.lt.s32.totalorder %v499_v54, 4 }
  0x2a   :  { %v102_v24 = vadd.s32 %v101_v52, %v91_v28  ;;  %v72_v59 = vsel %vm66_vm5, %v69_v63, %v71_v11  ;;  %v124_v60 = vadd.s32 %v123_v58, %v113_v38  ;;  %v228_v43 = vsel %vm220_vm10, %v524_v12, %v526_v13 }
  0x2b   :  { %v229_v61 = vsel %vm223_vm13, %v216_v55, 920167782  ;;  %v232_v1 = vsel %vm220_vm10, %v526_v13, %v213_v32  ;;  %v237_v23 = vand.u32 65535, %v481_v37  ;;  %v233_v6 = vsel %vm223_vm13, %v219_v34, 1326507024 }
  0x2c   :  { %v557_v62 = vadd.s32 %v102_v24, %v93_v33  ;;  %v230_v0 = vsel %vm222_vm11, %v213_v32, %v229_v61  ;;  %v125_v63 = vadd.s32 %v124_v60, %v115_v40  ;;  %v238_v8 = vshrl.u32 %v481_v37, 16 }
  0x2d   :  { %v231_v2 = vsel %vm221_vm12, %v228_v43, %v230_v0  ;;  %v126_v9 = vmul.u32 %v471_v19, %v72_v59  ;;  %v234_v10 = vsel %vm222_vm11, %v216_v55, %v233_v6  ;;  %v204_v21 = vshrl.u32 %v430_v26, %v490_v48 }
  0x2e   :  { %vm128_vm14 = vc.u32 %v557_v62, %v543_v57  ;;  %v261_v11 = vand.u32 65535, %v231_v2  ;;  %v129_v14 = vadd.s32 1, %v125_v63  ;;  %v235_v15 = vsel %vm221_vm12, %v232_v1, %v234_v10 }
  0x2f   :  { %v262_v16 = vshrl.u32 %v231_v2, 16  ;;  %v239_v17 = vand.u32 65535, %v235_v15  ;;  %v240_v18 = vshrl.u32 %v235_v15, 16  ;;  %v225_v38 = vsel %vm223_vm13, %v213_v32, 2102212464 }
  0x30   :  { %v130_v20 = vsel %vm128_vm14, %v129_v14, %v125_v63  ;;  %v265_v19 = vmul.u32 %v261_v11, %v238_v8  ;;  %v263_v29 = vmul.u32 %v261_v11, %v237_v23  ;;  %v224_v40 = vsel %vm220_vm10, %v204_v21, %v524_v12 }
  0x31   :  { %v264_v22 = vmul.u32 %v262_v16, %v237_v23  ;;  %v131_v25 = vadd.s32 %v130_v20, %v126_v9  ;;  %v241_v27 = vmul.u32 %v239_v17, %v237_v23  ;;  %v242_v28 = vmul.u32 %v240_v18, %v237_v23 }
  0x32   :  { %v243_v31 = vmul.u32 %v239_v17, %v238_v8  ;;  %v244_v39 = vmul.u32 %v240_v18, %v238_v8  ;;  %v266_v26 = vmul.u32 %v262_v16, %v238_v8  ;;  %v269_v48 = vshll.u32 %v265_v19, 16 }
  0x33   :  { %v267_v33 = vshll.u32 %v264_v22, 16  ;;  %v132_v35 = vadd.s32 536870912, %v131_v25  ;;  %v245_v30 = vshll.u32 %v242_v28, 16  ;;  %v226_v46 = vsel %vm222_vm11, %v526_v13, %v225_v38 }
  0x34   :  { %v247_v42 = vshll.u32 %v243_v31, 16  ;;  %v246_v12 = vshrl.u32 %v242_v28, 16  ;;  %v268_v52 = vshrl.u32 %v264_v22, 16  ;;  %v248_v56 = vshrl.u32 %v243_v31, 16 }
  0x35   :  { %v584_v45 = vshrl.u32 %v132_v35, 30  ;;  %vm249_vm15 = vc.u32 %v241_v27, %v245_v30  ;;  %v251_v36 = vadd.s32 %v245_v30, %v241_v27  ;;  %vm271_vm0 = vc.u32 %v263_v29, %v267_v33 }
  0x36   :  { %v250_v47 = vsel %vm249_vm15, 1, %v436_v44  ;;  %v272_v41 = vsel %vm271_vm0, 1, %v436_v44  ;;  %v273_v49 = vadd.s32 %v267_v33, %v263_v29  ;;  %v270_v24 = vshrl.u32 %v265_v19, 16 }
  0x37   :  { %v134_v50 = vshll.u32 %v584_v45, 30  ;;  %v252_v51 = vadd.s32 %v250_v47, %v244_v39  ;;  %vm253_vm1 = vc.u32 %v251_v36, %v247_v42  ;;  %v274_v53 = vadd.s32 %v272_v41, %v266_v26 }
  0x38   :  { %v254_v32 = vsel %vm253_vm1, 1, %v436_v44  ;;  %vm275_vm2 = vc.u32 %v273_v49, %v269_v48  ;;  %v277_v43 = vadd.s32 %v273_v49, %v269_v48  ;;  %v227_v61 = vsel %vm221_vm12, %v224_v40, %v226_v46 }
  0x39   :  { %v135_v55 = vsub.s32 %v131_v25, %v134_v50  ;;  %v256_v58 = vadd.s32 %v254_v32, %v252_v51  ;;  %v276_v13 = vsel %vm275_vm2, 1, %v436_v44  ;;  %v281_v6 = vmul.u32 %v481_v37, %v227_v61 }
  0x3a   :  { %v278_v34 = vadd.s32 %v276_v13, %v274_v53  ;;  %v127_v44 = vadd.s32 %v543_v57, %v557_v62  ;;  %v157_v31 = vsub.s32 4, %v584_v45  ;;  %vm35_vm7 = vcmp.lt.s32.totalorder %v459_v3, 0 }
  0x3b   :  { %vm136_vm3 = vcmp.lt.s32.totalorder %v135_v55, 0  ;;  %v137_v59 = vsub.s32 0, %v135_v55  ;;  %v257_v60 = vadd.s32 %v256_v58, %v246_v12  ;;  %vm606_vm8 = vcmp.le.f32.partialorder %v33_v5, 0.7853982 }
  0x3c   :  { %v279_v0 = vadd.s32 %v278_v34, %v268_v52  ;;  %v158_v40 = vsel %vm35_vm7, %v157_v31, %v584_v45  ;;  %vm190_vm11 = vcmp.lt.s32.totalorder %v461_v4, 0  ;;  %vm620_vm13 = vcmp.le.f32.partialorder %v188_v7, 0.7853982 }
  0x3d   :  { %v138_v1 = vsel %vm136_vm3, %v137_v59, %v135_v55  ;;  %v258_v23 = vadd.s32 %v257_v60, %v248_v56  ;;  %v160_v46 = vsel %vm606_vm8, 0, %v158_v40  ;;  %vm176_vm15 = vweird.f32 %v459_v3 }
  0x3e   :  { %v139_v63 = vclz %v138_v1  ;;  %v280_v2 = vadd.s32 %v279_v0, %v270_v24  ;;  %v177_v52 = vadd.s32 3, %v160_v46  ;;  %vm331_vm3 = vweird.f32 %v461_v4 }
  0x3f   :  { %vm283_vm4 = vc.u32 %v258_v23, %v277_v43  ;;  %v282_v36 = vadd.s32 %v277_v43, %v258_v23 }
  0x40   :  { %v363_v8 = vadd.s32 4294967294, %v139_v63  ;;  %v284_v9 = vadd.s32 1, %v280_v2  ;;  %v178_v59 = vand.u32 3, %v177_v52 }
  0x42   :  { %vm364_vm5 = vcmp.lt.s32.totalorder %v363_v8, 0  ;;  %v285_v10 = vsel %vm283_vm4, %v284_v9, %v280_v2  ;;  %vm183_vm10 = vcmp.eq.s32.totalorder %v178_v59, 2  ;;  %vm180_vm12 = vcmp.eq.s32.totalorder %v178_v59, 0 }
  0x43   :  { %v142_v11 = vsel %vm364_vm5, 0, %v363_v8  ;;  %v286_v14 = vadd.s32 %v285_v10, %v281_v6  ;;  %vm179_vm14 = vcmp.lt.s32.totalorder %v178_v59, 2 }
  0x44   :  { %v143_v15 = vsub.s32 32, %v142_v11  ;;  %v144_v54 = vshll.u32 %v135_v55, %v142_v11  ;;  %v147_v16 = vsub.s32 4294967266, %v142_v11 }
  0x45   :  { %v287_v17 = vadd.s32 536870912, %v286_v14 }
  0x46   :  { %v145_v18 = vshrl.u32 %v127_v44, %v143_v15  ;;  %v148_v20 = vadd.s32 127, %v147_v16 }
  0x47   :  { %v599_v21 = vshrl.u32 %v287_v17, 30 }
  0x48   :  { %v146_v22 = vor.u32 %v145_v18, %v144_v54  ;;  %v149_v37 = vshll.u32 %v148_v20, 23 }
  0x49   :  { %v289_v19 = vshll.u32 %v599_v21, 30  ;;  %v312_v9 = vsub.s32 4, %v599_v21 }
  0x4a   :  { %v150_v25 = vor.u32 4788187, %v149_v37  ;;  %v153_v27 = vcvt.s32.f32 %v146_v22 }
  0x4b   :  { %v290_v28 = vsub.s32 %v286_v14, %v289_v19  ;;  %v313_v16 = vsel %vm190_vm11, %v312_v9, %v599_v21 }
  0x4c   :  { %v151_v57 = vand.u32 2147483647, %v150_v25  ;;  %v315_v22 = vsel %vm620_vm13, 0, %v313_v16 }
  0x4d   :  { %vm291_vm6 = vcmp.lt.s32.totalorder %v290_v28, 0  ;;  %v292_v62 = vsub.s32 0, %v290_v28 }
  0x4e   :  { %v154_v29 = vmul.f32 %v153_v27, %v151_v57 }
  0x4f   :  { %v293_v33 = vsel %vm291_vm6, %v292_v62, %v290_v28 }
  0x50   :  { %v155_v38 = vxor.u32 2147483648, %v154_v29  ;;  %v294_v39 = vclz %v293_v33 }
  0x52   :  { %v156_v30 = vsel %vm35_vm7, %v155_v38, %v154_v29  ;;  %v366_v42 = vadd.s32 4294967294, %v294_v39 }
  0x53   :  { %v159_v26 = vsel %vm606_vm8, %v459_v3, %v156_v30  ;;  %v332_v3 = vadd.s32 3, %v315_v22 }
  0x54   :  { %v161_v48 = vmul.f32 %v159_v26, %v159_v26  ;;  %vm367_vm9 = vcmp.lt.s32.totalorder %v366_v42, 0 }
  0x55   :  { %v297_v5 = vsel %vm367_vm9, 0, %v366_v42  ;;  %v333_v29 = vand.u32 3, %v332_v3 }
  0x56   :  { %v162_v47 = vmul.f32 -0.001358992, %v161_v48  ;;  %v169_v41 = vmul.f32 -0.00019511016, %v161_v48  ;;  %v298_v49 = vsub.s32 32, %v297_v5  ;;  %v299_v50 = vshll.u32 %v290_v28, %v297_v5 }
  0x57   :  { %v302_v12 = vsub.s32 4294967266, %v297_v5  ;;  %vm338_vm0 = vcmp.eq.s32.totalorder %v333_v29, 2  ;;  %vm335_vm1 = vcmp.eq.s32.totalorder %v333_v29, 0  ;;  %vm334_vm2 = vcmp.lt.s32.totalorder %v333_v29, 2 }
  0x58   :  { %v163_v51 = vadd.f32 0.041655596, %v162_v47  ;;  %v170_v32 = vadd.f32 0.008332121, %v169_v41  ;;  %v300_v45 = vshrl.u32 %v282_v36, %v298_v49 }
  0x59   :  { %v303_v53 = vadd.s32 127, %v302_v12 }
  0x5a   :  { %v164_v55 = vmul.f32 %v163_v51, %v161_v48  ;;  %v171_v56 = vmul.f32 %v170_v32, %v161_v48  ;;  %v301_v58 = vor.u32 %v300_v45, %v299_v50 }
  0x5b   :  { %v304_v13 = vshll.u32 %v303_v53, 23 }
  0x5c   :  { %v165_v24 = vadd.f32 -0.4999988, %v164_v55  ;;  %v172_v34 = vadd.f32 -0.16666654, %v171_v56  ;;  %v308_v43 = vcvt.s32.f32 %v301_v58 }
  0x5d   :  { %v305_v60 = vor.u32 4788187, %v304_v13 }
  0x5e   :  { %v166_v61 = vmul.f32 %v165_v24, %v161_v48  ;;  %v173_v0 = vmul.f32 %v172_v34, %v161_v48 }
  0x5f   :  { %v306_v1 = vand.u32 2147483647, %v305_v60 }
  0x60   :  { %v167_v23 = vadd.f32 1.0, %v166_v61  ;;  %v174_v63 = vadd.f32 1.0, %v173_v0 }
  0x61   :  { %v309_v2 = vmul.f32 %v308_v43, %v306_v1 }
  0x62   :  { %v175_v6 = vmul.f32 %v174_v63, %v159_v26  ;;  %v184_v8 = vxor.u32 2147483648, %v167_v23 }
  0x63   :  { %v310_v10 = vxor.u32 2147483648, %v309_v2 }
  0x64   :  { %v181_v11 = vxor.u32 2147483648, %v175_v6  ;;  %v185_v14 = vsel %vm183_vm10, %v184_v8, %v175_v6 }
  0x65   :  { %v311_v15 = vsel %vm190_vm11, %v310_v10, %v309_v2 }
  0x66   :  { %v182_v54 = vsel %vm180_vm12, %v167_v23, %v181_v11  ;;  %v314_v17 = vsel %vm620_vm13, %v461_v4, %v311_v15 }
  0x67   :  { %v186_v18 = vsel %vm179_vm14, %v182_v54, %v185_v14  ;;  %v316_v20 = vmul.f32 %v314_v17, %v314_v17 }
  0x68   :  { %v187_v7 = vsel %vm176_vm15, nan, %v186_v18 }
  0x69   :  { %v317_v37 = vmul.f32 -0.001358992, %v316_v20  ;;  %v324_v19 = vmul.f32 -0.00019511016, %v316_v20  ;;  %343 = vst [vmem:[#allocation6] sm:$0xff] %v187_v7 }
  0x6b   :  { %v318_v25 = vadd.f32 0.041655596, %v317_v37  ;;  %v325_v27 = vadd.f32 0.008332121, %v324_v19 }
  0x6d   :  { %v319_v28 = vmul.f32 %v318_v25, %v316_v20  ;;  %v326_v57 = vmul.f32 %v325_v27, %v316_v20 }
  0x6f   :  { %v320_v62 = vadd.f32 -0.4999988, %v319_v28  ;;  %v327_v21 = vadd.f32 -0.16666654, %v326_v57 }
  0x71   :  { %v321_v31 = vmul.f32 %v320_v62, %v316_v20  ;;  %v328_v33 = vmul.f32 %v327_v21, %v316_v20 }
  0x73   :  { %v322_v35 = vadd.f32 1.0, %v321_v31  ;;  %v329_v38 = vadd.f32 1.0, %v328_v33 }
  0x75   :  { %v330_v39 = vmul.f32 %v329_v38, %v314_v17  ;;  %v339_v30 = vxor.u32 2147483648, %v322_v35 }
  0x77   :  { %v336_v40 = vxor.u32 2147483648, %v330_v39  ;;  %v340_v42 = vsel %vm338_vm0, %v339_v30, %v330_v39 }
  0x79   :  { %v337_v26 = vsel %vm335_vm1, %v322_v35, %v336_v40 }
  0x7a   :  { %v341_v48 = vsel %vm334_vm2, %v337_v26, %v340_v42 }
  0x7b   :  { %v342_v36 = vsel %vm331_vm3, nan, %v341_v48 }
  0x7c   :  { %344 = vst [vmem:[#allocation6 + $0x8] sm:$0xff] %v342_v36 }
  0x7d   :  { %355 = dma.vmem_to_hbm [thread:$0]  %s351_s1, 256, %s353_s18, [#allocation5]  }
  0x7e   :  { %427 = dma.done.wait [#allocation5], 256  }
  0x7f   :  { %428 = vsyncadd [#allocation5], 4294967040 }
  0x80   :  { %360 = vsyncpa [#allocation4], 1 }
  0x81   :  { %361 = vsyncpa [#allocation5], 1 }

</bundles_post_ra>
